<compile_context>
chip_gen: v5e
topology: v5e:2x2
jax: 0.10.0
libtpu: 0.0.40
codegen_flags: <defaults>
</compile_context>

<pallas_src>
import functools
import math

import jax
import jax.numpy as jnp
from jax import lax
from jax.experimental import pallas as pl
from jax.experimental.pallas import tpu as pltpu


def _round_up(x: int, m: int) -> int:
    return (x + m - 1) // m * m


def _sublane_pack(dtype) -> int:
    """Sublane packing factor for the second-to-last dim (8 f32 / 16 bf16 / 32 int8)."""
    itemsize = jnp.dtype(dtype).itemsize
    return max(8, 32 // max(itemsize, 1))


def _pick_tile(padded_ext: int, target: int, quantum: int) -> int:
    """Largest multiple of `quantum` that divides `padded_ext` and is <= target."""
    t = min(target, padded_ext)
    t = max((t // quantum) * quantum, quantum)
    while padded_ext % t != 0:
        t -= quantum
    return t


def _vmem_limit_bytes() -> int:
    """Per-generation scoped-VMEM limit: physical minus 16 MiB headroom."""
    try:
        phys = getattr(pltpu.get_tpu_info(), "vmem_capacity_bytes", None)
        if phys:
            return max(32 * 1024 * 1024, int(phys) - 16 * 1024 * 1024)
    except Exception:
        pass
    return 48 * 1024 * 1024  # safe everywhere (v7x physical per-TC VMEM is 64 MiB)


def _monotonic_linear_kernel(x_ref, w_ref, b_ref, o_ref, acc_ref, *, feed_dtype):
    k = pl.program_id(2)

    @pl.when(k == 0)
    def _():
        acc_ref[...] = jnp.zeros_like(acc_ref)

    # abs on the (tn, tk) weight tile (VPU, hides under the MXU slot).
    x = x_ref[...]
    w_abs = jnp.abs(w_ref[...])
    if feed_dtype is not None:
        x = x.astype(feed_dtype)
        w_abs = w_abs.astype(feed_dtype)

    # Contract x's K (dim 1) against W's K (dim 1) -> (tm, tn); transposed-RHS MXU
    # path, no in-kernel transpose / relayout of the weight tile.
    acc_ref[...] += lax.dot_general(
        x,
        w_abs,
        dimension_numbers=(((1,), (1,)), ((), ())),
        preferred_element_type=jnp.float32,
    )

    @pl.when(k == pl.num_programs(2) - 1)
    def _():
        o_ref[...] = (acc_ref[...] + b_ref[...].astype(jnp.float32)).astype(o_ref.dtype)


def monotonic_linear(x, weight, bias=None, *, tm=512, tn=512, tk=1024,
                     feed_dtype=None):
    """y = x @ |weight|^T + bias, computed by a tiled Pallas TPU kernel.

    feed_dtype: optional dtype (e.g. jnp.bfloat16) for the MXU feeds; accumulation
    stays float32. None keeps the input dtype exactly.
    """
    B, in_f = x.shape
    out_f, in_f2 = weight.shape
    assert in_f == in_f2, "weight in_features must match x's last dim"

    if bias is None:
        bias = jnp.zeros((out_f,), dtype=x.dtype)

    # --- Padding: only to hardware granularity, NOT to tile granularity. ---
    m_pack = _sublane_pack(x.dtype)
    Mp = _round_up(B, m_pack)
    Np = _round_up(out_f, 128)
    Kp = _round_up(in_f, 128)

    # --- Tile selection: largest divisor of the padded extent <= target. ---
    tm = _pick_tile(Mp, tm, m_pack)
    tn = _pick_tile(Np, tn, 128)
    tk = _pick_tile(Kp, tk, 128)

    # Megacore: make sure >=2 parallel tiles exist when N can be split (v7x has
    # two TensorCores; on single-TC chips this only adds one cheap grid step).
    if (Mp // tm) * (Np // tn) < 2 and Np >= 256:
        tn = _pick_tile(Np, max(128, Np // 2), 128)

    # Zero padding is exact: |0| = 0 adds nothing along K; padded M/N are sliced off.
    x_p = x if (Mp == B and Kp == in_f) else jnp.pad(
        x, ((0, Mp - B), (0, Kp - in_f)))
    w_p = weight if (Np == out_f and Kp == in_f) else jnp.pad(
        weight, ((0, Np - out_f), (0, Kp - in_f)))
    b_p = bias.reshape(1, out_f)
    if Np != out_f:
        b_p = jnp.pad(b_p, ((0, 0), (0, Np - out_f)))

    grid = (Mp // tm, Np // tn, Kp // tk)

    kernel = functools.partial(_monotonic_linear_kernel, feed_dtype=feed_dtype)

    out_p = pl.pallas_call(
        kernel,
        out_shape=jax.ShapeDtypeStruct((Mp, Np), x.dtype),
        grid_spec=pltpu.PrefetchScalarGridSpec(
            num_scalar_prefetch=0,
            grid=grid,
            in_specs=[
                pl.BlockSpec((tm, tk), lambda i, j, k: (i, k)),   # x tile
                pl.BlockSpec((tn, tk), lambda i, j, k: (j, k)),   # W tile (no transpose)
                pl.BlockSpec((1, tn), lambda i, j, k: (0, j)),    # bias tile
            ],
            out_specs=pl.BlockSpec((tm, tn), lambda i, j, k: (i, j)),
            scratch_shapes=[pltpu.VMEM((tm, tn), jnp.float32)],
        ),
        compiler_params=pltpu.CompilerParams(
            # M, N independent (megacore shardable); K is the reduction, last.
            dimension_semantics=("parallel", "parallel", "arbitrary"),
            vmem_limit_bytes=_vmem_limit_bytes(),
        ),
    )(x_p, w_p, b_p)

    if (Mp, Np) != (B, out_f):
        out_p = out_p[:B, :out_f]
    return out_p


def init_params(key, in_features, out_features, dtype=jnp.float32):
    """Deterministic init matching nn.Linear.reset_parameters():
    kaiming_uniform_(a=sqrt(5)) -> U(-1/sqrt(fan_in), 1/sqrt(fan_in)) for weight,
    bias ~ U(-1/sqrt(fan_in), 1/sqrt(fan_in))."""
    kw, kb = jax.random.split(key)
    fan_in = in_features
    gain = math.sqrt(2.0 / (1.0 + 5.0))
    bound_w = gain * math.sqrt(3.0) / math.sqrt(fan_in)  # == 1/sqrt(fan_in)
    weight = jax.random.uniform(
        kw, (out_features, in_features), dtype, -bound_w, bound_w
    )
    bound_b = 1.0 / math.sqrt(fan_in)
    bias = jax.random.uniform(kb, (out_features,), dtype, -bound_b, bound_b)
    return weight, bias


if __name__ == "__main__":
    key = jax.random.PRNGKey(0)
    k_x, k_p, k2_x, k2_p = jax.random.split(key, 4)

    # Case 1: module-sized demo (small, single grid step after 8/128 padding).
    B, in_features, out_features = 8, 32, 16
    x = jax.random.normal(k_x, (B, in_features), jnp.float32)
    weight, bias = init_params(k_p, in_features, out_features)

    y = jax.block_until_ready(monotonic_linear(x, weight, bias))
    y_ref = x @ jnp.abs(weight).T + bias
    assert y.shape == (B, out_features)
    assert jnp.allclose(y, y_ref, atol=1e-5, rtol=1e-5)

    # Case 2: awkward shapes -> exercise multi-tile grid, f32 accumulator carry,
    # bias-at-last-K, and the decoupled (128/8) padding path with small tiles.
    B2, in2, out2 = 16, 250, 200
    x2 = jax.random.normal(k2_x, (B2, in2), jnp.float32)
    w2, b2 = init_params(k2_p, in2, out2)
    y2 = jax.block_until_ready(
        monotonic_linear(x2, w2, b2, tm=8, tn=128, tk=128)
    )
    y2_ref = x2 @ jnp.abs(w2).T + b2
    assert y2.shape == (B2, out2)
    assert jnp.allclose(y2, y2_ref, atol=1e-4, rtol=1e-4)

    # Case 3: optional bf16 MXU feeds (f32 accumulation) — looser tolerance.
    y3 = jax.block_until_ready(
        monotonic_linear(x2, w2, b2, feed_dtype=jnp.bfloat16)
    )
    assert jnp.allclose(y3, y2_ref, atol=5e-2, rtol=5e-2)

    print("KERNEL_OK")
</pallas_src>

<mosaic_0001>
module attributes {stable_mosaic.version = 11 : i64} {
  func.func @_monotonic_linear_kernel(%arg0: i32, %arg1: i32, %arg2: i32, %arg3: memref<8x128xf32, #tpu.memory_space<vmem>>, %arg4: memref<128x128xf32, #tpu.memory_space<vmem>>, %arg5: memref<1x128xf32, #tpu.memory_space<vmem>>, %arg6: memref<8x128xf32, #tpu.memory_space<vmem>>, %arg7: memref<8x128xf32, #tpu.memory_space<vmem>>) attributes {dimension_semantics = [#tpu.dimension_semantics<parallel>, #tpu.dimension_semantics<parallel>, #tpu.dimension_semantics<arbitrary>], iteration_bounds = array<i64: 1, 1, 1>, scalar_prefetch = 0 : i64, scratch_operands = 1 : i64, tpu.core_type = #tpu.core_type<tc>, window_params = [{transform_indices = @transform_0, window_bounds = array<i64: 8, 128>}, {transform_indices = @transform_1, window_bounds = array<i64: 128, 128>}, {transform_indices = @transform_2, window_bounds = array<i64: 1, 128>}, {transform_indices = @transform_3, window_bounds = array<i64: 8, 128>}]} {
    %c0_i32 = arith.constant 0 : i32
    %0 = arith.cmpi eq, %arg2, %c0_i32 : i32
    %1 = arith.extui %0 : i1 to i32
    %c0_i32_0 = arith.constant 0 : i32
    %2 = arith.cmpi ne, %1, %c0_i32_0 : i32
    scf.if %2 {
      %cst_10 = arith.constant 0.000000e+00 : f32
      %13 = vector.broadcast %cst_10 : f32 to vector<8x128xf32>
      %c0_11 = arith.constant 0 : index
      %c0_12 = arith.constant 0 : index
      %14 = vector.load %arg7[%c0_11, %c0_12] : memref<8x128xf32, #tpu.memory_space<vmem>>, vector<8x128xf32>
      tpu.vector_store %arg7[%c0_11, %c0_12], %13 {strides = array<i32>} : memref<8x128xf32, #tpu.memory_space<vmem>>, vector<8x128xf32>,
    } else {
    }
    %c0 = arith.constant 0 : index
    %c0_1 = arith.constant 0 : index
    %3 = vector.load %arg3[%c0, %c0_1] : memref<8x128xf32, #tpu.memory_space<vmem>>, vector<8x128xf32>
    %c0_2 = arith.constant 0 : index
    %c0_3 = arith.constant 0 : index
    %4 = vector.load %arg4[%c0_2, %c0_3] : memref<128x128xf32, #tpu.memory_space<vmem>>, vector<128x128xf32>
    %5 = math.absf %4 : vector<128x128xf32>
    %c0_4 = arith.constant 0 : index
    %c0_5 = arith.constant 0 : index
    %6 = vector.load %arg7[%c0_4, %c0_5] : memref<8x128xf32, #tpu.memory_space<vmem>>, vector<8x128xf32>
    %cst = arith.constant dense<0.000000e+00> : vector<8x128xf32>
    %7 = tpu.matmul %3, %5, %cst {dimension_numbers = #tpu.dot_dimension_numbers<[1], [1], [0], [0], [0, 0, 1, 0], [], []>} : vector<8x128xf32>, vector<128x128xf32>, vector<8x128xf32> -> vector<8x128xf32>
    %8 = arith.addf %6, %7 : vector<8x128xf32>
    %c0_6 = arith.constant 0 : index
    %c0_7 = arith.constant 0 : index
    %9 = vector.load %arg7[%c0_6, %c0_7] : memref<8x128xf32, #tpu.memory_space<vmem>>, vector<8x128xf32>
    tpu.vector_store %arg7[%c0_6, %c0_7], %8 {strides = array<i32>} : memref<8x128xf32, #tpu.memory_space<vmem>>, vector<8x128xf32>,
    %c0_i32_8 = arith.constant 0 : i32
    %10 = arith.cmpi eq, %arg2, %c0_i32_8 : i32
    %11 = arith.extui %10 : i1 to i32
    %c0_i32_9 = arith.constant 0 : i32
    %12 = arith.cmpi ne, %11, %c0_i32_9 : i32
    scf.if %12 {
      %c0_10 = arith.constant 0 : index
      %c0_11 = arith.constant 0 : index
      %13 = vector.load %arg7[%c0_10, %c0_11] : memref<8x128xf32, #tpu.memory_space<vmem>>, vector<8x128xf32>
      %c0_12 = arith.constant 0 : index
      %c0_13 = arith.constant 0 : index
      %14 = vector.load %arg5[%c0_12, %c0_13] : memref<1x128xf32, #tpu.memory_space<vmem>>, vector<1x128xf32>
      %15 = vector.broadcast %14 : vector<1x128xf32> to vector<8x128xf32>
      %16 = arith.addf %13, %15 : vector<8x128xf32>
      %c0_14 = arith.constant 0 : index
      %c0_15 = arith.constant 0 : index
      %17 = vector.load %arg6[%c0_14, %c0_15] : memref<8x128xf32, #tpu.memory_space<vmem>>, vector<8x128xf32>
      tpu.vector_store %arg6[%c0_14, %c0_15], %16 {strides = array<i32>} : memref<8x128xf32, #tpu.memory_space<vmem>>, vector<8x128xf32>,
    } else {
    }
    return
  }
  func.func @transform_0(%arg0: i32, %arg1: i32, %arg2: i32) -> (i32, i32) {
    %c0_i32 = arith.constant 0 : i32
    return %arg0, %arg2 : i32, i32
  }
  func.func @transform_1(%arg0: i32, %arg1: i32, %arg2: i32) -> (i32, i32) {
    %c0_i32 = arith.constant 0 : i32
    return %arg1, %arg2 : i32, i32
  }
  func.func @transform_2(%arg0: i32, %arg1: i32, %arg2: i32) -> (i32, i32) {
    %c0_i32 = arith.constant 0 : i32
    %c0_i32_0 = arith.constant 0 : i32
    return %c0_i32, %arg1 : i32, i32
  }
  func.func @transform_3(%arg0: i32, %arg1: i32, %arg2: i32) -> (i32, i32) {
    %c0_i32 = arith.constant 0 : i32
    return %arg0, %arg1 : i32, i32
  }
}

</mosaic_0001>

<bundles_post_ra>
// kernel: tpu_custom_call.1
= control target key start
LH: loop header
LB: loop body
LE: loop exit
PB: predicated region body
PF: predicated region fallthrough
CT: control target
= control target key end

     0   :  { %8 = vsyncpa [#allocation4], 0  ;;  %s255_s0 = inlined_call_operand.hbm [shape: f32[8,128], index: 0, kind: input, shape index: {}]   ;;  %s256_s1 = inlined_call_operand.hbm [shape: f32[128,128], index: 1, kind: input, shape index: {}]   ;;  %s257_s2 = inlined_call_operand.vmem [shape: f32[1,128], index: 2, kind: input, shape index: {}]   ;;  %s258_s3 = inlined_call_operand.hbm [shape: f32[8,128], index: 3, kind: output, shape index: {}]  }
   0x1   :  { %9 = vsyncpa [#allocation7], 0 }
   0x2   :  { %10 = vsyncpa [#allocation5], 0  ;;  %s16_s14 = sshll.u32 %s255_s0, 4  ;;  %s218_s15 = smov [#allocation3]   ;;  %s17_s14 = int_to_ptr.hbm [resolvable:$true] %s16_s14 }
   0x3   :  { %s18_s16 = sshll.u32 %s218_s15, 4  ;;  %s26_s19 = sshll.u32 %s256_s1, 4  ;;  %s19_s16 = int_to_ptr.vmem [resolvable:$true] %s18_s16  ;;  %s27_s19 = int_to_ptr.hbm [resolvable:$true] %s26_s19 }
   0x4   :  { %21 = dma.hbm_to_vmem [thread:$0]  %s17_s14, 128, %s19_s16, [#allocation4]  }
   0x5   :  { %s219_s20 = smov [#allocation6]   ;;  %s220_s22 = smov 128  }
   0x6   :  { %s28_s21 = sshll.u32 %s219_s20, 4  ;;  %s221_s23 = smov 8   ;;  %s29_s21 = int_to_ptr.vmem [resolvable:$true] %s28_s21 }
   0x7   :  { %34 = dma.hbm_to_vmem [thread:$0]  %s27_s19, 2048, %s29_s21, [#allocation7], %s220_s22, %s220_s22, %s221_s23  }
   0x8   :  { %212 = dma.done.wait [#allocation4], 128  }
   0x9   :  { %213 = vsyncadd [#allocation4], 4294967168 }
   0xa   :  { %214 = dma.done.wait [#allocation7], 2048  }
   0xb   :  { %215 = vsyncadd [#allocation7], 4294965248  ;;  %v66_v0 = vld [vmem:[#allocation6 + $0x78] sm:$0xff]  ;;  %v65_v1 = vld [vmem:[#allocation6 + $0x70] sm:$0xff]  ;;  %s222_s24 = smov [#allocation8]   ;;  %s123_s28 = sshll.u32 %s258_s3, 4  ;;  %s124_s28 = int_to_ptr.hbm [resolvable:$true] %s123_s28 }
   0xc   :  { %v82_v2 = vand.u32 2147483647, %v66_v0  ;;  %v81_v3 = vand.u32 2147483647, %v65_v1  ;;  %v64_v4 = vld [vmem:[#allocation6 + $0x68] sm:$0xff]  ;;  %v63_v6 = vld [vmem:[#allocation6 + $0x60] sm:$0xff] }
   0xd   :  { %v80_v5 = vand.u32 2147483647, %v64_v4  ;;  %v79_v7 = vand.u32 2147483647, %v63_v6  ;;  %v62_v8 = vld [vmem:[#allocation6 + $0x58] sm:$0xff]  ;;  %v61_v10 = vld [vmem:[#allocation6 + $0x50] sm:$0xff] }
   0xe   :  { %84 = vmatpush.xpose.msra.mxu0 %v82_v2  ;;  %v78_v9 = vand.u32 2147483647, %v62_v8  ;;  %v77_v11 = vand.u32 2147483647, %v61_v10  ;;  %v60_v12 = vld [vmem:[#allocation6 + $0x48] sm:$0xff]  ;;  %v59_v14 = vld [vmem:[#allocation6 + $0x40] sm:$0xff] }
   0xf   :  { %v76_v13 = vand.u32 2147483647, %v60_v12  ;;  %v75_v15 = vand.u32 2147483647, %v59_v14  ;;  %v58_v16 = vld [vmem:[#allocation6 + $0x38] sm:$0xff]  ;;  %v57_v18 = vld [vmem:[#allocation6 + $0x30] sm:$0xff] }
  0x10   :  { %v74_v17 = vand.u32 2147483647, %v58_v16  ;;  %v73_v19 = vand.u32 2147483647, %v57_v18  ;;  %v56_v20 = vld [vmem:[#allocation6 + $0x28] sm:$0xff]  ;;  %v55_v22 = vld [vmem:[#allocation6 + $0x20] sm:$0xff] }
  0x11   :  { %v72_v21 = vand.u32 2147483647, %v56_v20  ;;  %v71_v23 = vand.u32 2147483647, %v55_v22  ;;  %v54_v24 = vld [vmem:[#allocation6 + $0x18] sm:$0xff]  ;;  %v53_v26 = vld [vmem:[#allocation6 + $0x10] sm:$0xff] }
  0x12   :  { %85 = vmatpush.xpose.msra.mxu0 %v81_v3  ;;  %v70_v25 = vand.u32 2147483647, %v54_v24  ;;  %v69_v27 = vand.u32 2147483647, %v53_v26  ;;  %v52_v28 = vld [vmem:[#allocation6 + $0x8] sm:$0xff]  ;;  %v51_v30 = vld [vmem:[#allocation6] sm:$0xff] }
  0x13   :  { %v68_v29 = vand.u32 2147483647, %v52_v28  ;;  %v67_v31 = vand.u32 2147483647, %v51_v30  ;;  %v50_v32 = vld [vmem:[#allocation3] sm:$0xff]  ;;  %s121_s25 = sshll.u32 %s222_s24, 4  ;;  %s122_s25 = int_to_ptr.vmem [resolvable:$true] %s121_s25 }
  0x14   :  { %v139_v33 = vld [vmem:[%s257_s2] ss:$0 sm:$0xff] }
  0x16   :  { %86 = vmatpush.xpose.msra.mxu0 %v80_v5 }
  0x1a   :  { %87 = vmatpush.xpose.msra.mxu0 %v79_v7 }
  0x1e   :  { %88 = vmatpush.xpose.msra.mxu0 %v78_v9 }
  0x22   :  { %89 = vmatpush.xpose.msra.mxu0 %v77_v11 }
  0x26   :  { %90 = vmatpush.xpose.msra.mxu0 %v76_v13 }
  0x2a   :  { %91 = vmatpush.xpose.msra.mxu0 %v75_v15 }
  0x2e   :  { %92 = vmatpush.xpose.msra.mxu0 %v74_v17 }
  0x32   :  { %93 = vmatpush.xpose.msra.mxu0 %v73_v19 }
  0x36   :  { %94 = vmatpush.xpose.msra.mxu0 %v72_v21 }
  0x3a   :  { %95 = vmatpush.xpose.msra.mxu0 %v71_v23 }
  0x3e   :  { %96 = vmatpush.xpose.msra.mxu0 %v70_v25 }
  0x42   :  { %97 = vmatpush.xpose.msra.mxu0 %v69_v27 }
  0x46   :  { %98 = vmatpush.xpose.msra.mxu0 %v68_v29 }
  0x4a   :  { %99 = vmatpush.xpose.msra.mxu0 %v67_v31 }
  0x4d   :  { %100 = vmatmul.f32.vlgmr.msra.gmra.mxu0 %v50_v32 }
  0xca   :  { %v101_v34 = vpop.f32.mrf.mxu0 }
  0xcb   :  { %v114_v35 = vadd.f32 %v139_v33, %v101_v34 }
  0xcd   :  { %115 = vst [vmem:[#allocation8] sm:$0xff] %v114_v35 }
  0xce   :  { %126 = dma.vmem_to_hbm [thread:$0]  %s122_s25, 128, %s124_s28, [#allocation5]  }
  0xcf   :  { %216 = dma.done.wait [#allocation5], 128  }
  0xd0   :  { %217 = vsyncadd [#allocation5], 4294967168 }
  0xd1   :  { %131 = vsyncpa [#allocation4], 1 }
  0xd2   :  { %132 = vsyncpa [#allocation7], 1 }
  0xd3   :  { %133 = vsyncpa [#allocation5], 1 }

</bundles_post_ra>
